<compile_context>
chip_gen: v5e
topology: v5e:2x2
jax: 0.10.0
libtpu: 0.0.40
codegen_flags: <defaults>
</compile_context>

<pallas_src>
import functools

import jax
import jax.numpy as jnp
from jax.experimental import pallas as pl
from jax.experimental.pallas import tpu as pltpu

_NEG_BIG = -1e30  # finite "masked logit" bias for padded output columns


def _round_up(n, m):
    return ((n + m - 1) // m) * m


def mlp_kernel(x_ref, w1_ref, b1_ref, w2_ref, b2_ref, w3_ref, b3_ref, o_ref,
               *, approx_recip):
    # ---- Linear 1 + ReLU (f32 accumulation on the MXU) ----
    h1 = jnp.dot(x_ref[...], w1_ref[...], preferred_element_type=jnp.float32)
    h1 = jnp.maximum(h1 + b1_ref[...], 0.0)             # b1 is (1, H1), broadcasts
    # ---- Linear 2 + ReLU ----
    h2 = jnp.dot(h1.astype(w2_ref.dtype), w2_ref[...],
                 preferred_element_type=jnp.float32)
    h2 = jnp.maximum(h2 + b2_ref[...], 0.0)
    # ---- Linear 3 (padded to 128 lane-dense columns) + Softmax(dim=1) ----
    logits = jnp.dot(h2.astype(w3_ref.dtype), w3_ref[...],
                     preferred_element_type=jnp.float32)
    logits = logits + b3_ref[...]                        # fake cols get -1e30 bias
    m = jnp.max(logits, axis=-1, keepdims=True)
    e = jnp.exp(logits - m)                              # padded cols -> exp(-1e30) = 0
    denom = jnp.sum(e, axis=-1, keepdims=True)
    o_ref[...] = (e * pl.reciprocal(denom, approx=approx_recip)).astype(o_ref.dtype)


def prepare_params(w1, b1, w2, b2, w3, b3, *, matmul_dtype=None):
    """One-time (outside the hot loop) padding + casting of the weights.

    Weights are stored pre-transposed as (in, out); biases as (1, out).
    Hidden dim H2 and label dim L are padded to 128 (zero weight cols/rows,
    -1e30 bias on fake output columns so softmax gives them exactly 0).
    Biases always stay f32; only matmul operands take matmul_dtype.
    """
    P, H1 = w1.shape
    H2 = w2.shape[1]
    L = w3.shape[1]
    H2p = max(_round_up(H2, 128), 128)
    Lp = max(_round_up(L, 128), 128)

    b1p = b1.reshape(1, H1).astype(jnp.float32)
    w2p = jnp.pad(w2, ((0, 0), (0, H2p - H2)))                           # zero cols
    b2p = jnp.pad(b2.reshape(1, H2), ((0, 0), (0, H2p - H2))).astype(jnp.float32)
    w3p = jnp.pad(w3, ((0, H2p - H2), (0, Lp - L)))                      # zero rows/cols
    b3p = jnp.pad(b3.reshape(1, L), ((0, 0), (0, Lp - L)),
                  constant_values=_NEG_BIG).astype(jnp.float32)

    dt = matmul_dtype if matmul_dtype is not None else w1.dtype
    params = (w1.astype(dt), b1p, w2p.astype(dt), b2p, w3p.astype(dt), b3p)
    return jax.tree.map(jax.block_until_ready, params)


@functools.partial(jax.jit,
                   static_argnames=("num_labels", "block_b", "out_dtype",
                                    "approx_recip"))
def mlp_forward(x, w1, b1, w2, b2, w3, b3, *, num_labels, block_b=4096,
                out_dtype=jnp.float32, approx_recip=False):
    """x: (B, P); weights from prepare_params (pre-padded / pre-cast)."""
    B, P = x.shape
    H1 = w1.shape[1]
    H2p = w2.shape[1]
    Lp = w3.shape[1]

    # Cast the activations to the matmul operand dtype chosen at prepare time.
    x_in = x if x.dtype == w1.dtype else x.astype(w1.dtype)

    # Batch tile: biggest tile up to block_b (amortize per-step overhead), but
    # guarantee >= 2 grid steps when possible so v7x's two TensorCores both work.
    if B <= 8:
        bb = 8
    elif B <= block_b:
        bb = _round_up(pl.cdiv(B, 2), 8)
    else:
        bb = _round_up(block_b, 8)
    grid_b = pl.cdiv(B, bb)   # last block may be partial; rows are independent

    out = pl.pallas_call(
        functools.partial(mlp_kernel, approx_recip=approx_recip),
        out_shape=jax.ShapeDtypeStruct((B, Lp), out_dtype),
        grid_spec=pltpu.PrefetchScalarGridSpec(
            num_scalar_prefetch=0,
            grid=(grid_b,),
            in_specs=[
                pl.BlockSpec((bb, P), lambda i: (i, 0)),     # x: streams over batch
                pl.BlockSpec((P, H1), lambda i: (0, 0)),     # w1 (resident)
                pl.BlockSpec((1, H1), lambda i: (0, 0)),     # b1
                pl.BlockSpec((H1, H2p), lambda i: (0, 0)),   # w2 (padded, resident)
                pl.BlockSpec((1, H2p), lambda i: (0, 0)),    # b2
                pl.BlockSpec((H2p, Lp), lambda i: (0, 0)),   # w3 (padded, resident)
                pl.BlockSpec((1, Lp), lambda i: (0, 0)),     # b3
            ],
            out_specs=pl.BlockSpec((bb, Lp), lambda i: (i, 0)),  # lane-dense output
        ),
        compiler_params=pltpu.CompilerParams(
            dimension_semantics=("parallel",),     # batch axis shards across TCs
            vmem_limit_bytes=32 * 1024 * 1024,     # safe on v5e/v6e/v7x (2x tiles << 32 MiB)
        ),
    )(x_in, w1, b1, w2, b2, w3, b3)

    return out[:, :num_labels]


def init_linear_params(key, fan_in, fan_out):
    """Deterministic init mirroring PyTorch nn.Linear default U(-1/sqrt(fan_in), +)."""
    kw, kb = jax.random.split(key)
    bound = 1.0 / (fan_in ** 0.5)
    # stored as (in, out) == W^T relative to PyTorch's (out, in)
    w = jax.random.uniform(kw, (fan_in, fan_out), jnp.float32, -bound, bound)
    b = jax.random.uniform(kb, (1, fan_out), jnp.float32, -bound, bound)
    return w, b


def reference_forward(x, w1, b1, w2, b2, w3, b3):
    h1 = jnp.maximum(x @ w1 + b1, 0.0)
    h2 = jnp.maximum(h1 @ w2 + b2, 0.0)
    logits = h2 @ w3 + b3
    return jax.nn.softmax(logits, axis=1)


if __name__ == "__main__":
    # MLP(num_of_params=32, num_of_labels=10), configuration 0.
    # batch deliberately not a multiple of 8 or the tile -> exercises the
    # partial final block and the >=2-grid-step tiling.
    batch = 200
    num_of_params = 32
    num_of_labels = 10

    key = jax.random.PRNGKey(0)
    kx, k1, k2, k3 = jax.random.split(key, 4)

    x = jax.random.normal(kx, (batch, num_of_params), jnp.float32)
    w1, b1 = init_linear_params(k1, num_of_params, 128)
    w2, b2 = init_linear_params(k2, 128, 84)
    w3, b3 = init_linear_params(k3, 84, num_of_labels)

    ref = reference_forward(x, w1, b1, w2, b2, w3, b3)

    # --- f32 path (strict parity with the reference) ---
    params_f32 = prepare_params(w1, b1, w2, b2, w3, b3)
    out = mlp_forward(x, *params_f32, num_labels=num_of_labels,
                      out_dtype=jnp.float32, approx_recip=False)
    out = jax.block_until_ready(out)
    assert out.shape == (batch, num_of_labels)
    assert jnp.allclose(out, ref, atol=1e-5, rtol=1e-5), "mismatch vs reference (f32)"
    assert jnp.allclose(jnp.sum(out, axis=1), 1.0, atol=1e-5), "softmax rows must sum to 1"

    # --- bf16 matmul operands + bf16 writeback (recommended on v5e/v6e/v7x) ---
    params_bf16 = prepare_params(w1, b1, w2, b2, w3, b3, matmul_dtype=jnp.bfloat16)
    out_bf16 = mlp_forward(x, *params_bf16, num_labels=num_of_labels,
                           out_dtype=jnp.bfloat16, approx_recip=True)
    out_bf16 = jax.block_until_ready(out_bf16)
    assert out_bf16.dtype == jnp.bfloat16
    assert jnp.allclose(out_bf16.astype(jnp.float32), ref, atol=5e-2, rtol=5e-2), \
        "mismatch vs reference (bf16)"
    assert jnp.allclose(jnp.sum(out_bf16.astype(jnp.float32), axis=1), 1.0,
                        atol=2e-2), "bf16 softmax rows must sum to ~1"

    print("KERNEL_OK")
</pallas_src>

<mosaic_0001>
module attributes {stable_mosaic.version = 11 : i64} {
  func.func @mlp_kernel(%arg0: i32, %arg1: memref<104x32xf32, #tpu.memory_space<vmem>>, %arg2: memref<32x128xf32, #tpu.memory_space<vmem>>, %arg3: memref<1x128xf32, #tpu.memory_space<vmem>>, %arg4: memref<128x128xf32, #tpu.memory_space<vmem>>, %arg5: memref<1x128xf32, #tpu.memory_space<vmem>>, %arg6: memref<128x128xf32, #tpu.memory_space<vmem>>, %arg7: memref<1x128xf32, #tpu.memory_space<vmem>>, %arg8: memref<104x128xf32, #tpu.memory_space<vmem>>) attributes {dimension_semantics = [#tpu.dimension_semantics<parallel>], iteration_bounds = array<i64: 2>, scalar_prefetch = 0 : i64, scratch_operands = 0 : i64, tpu.core_type = #tpu.core_type<tc>, window_params = [{transform_indices = @transform_0, window_bounds = array<i64: 104, 32>}, {pipeline_mode = #tpu.pipeline_mode<synchronous>, transform_indices = @transform_1, window_bounds = array<i64: 32, 128>}, {pipeline_mode = #tpu.pipeline_mode<synchronous>, transform_indices = @transform_2, window_bounds = array<i64: 1, 128>}, {pipeline_mode = #tpu.pipeline_mode<synchronous>, transform_indices = @transform_3, window_bounds = array<i64: 128, 128>}, {pipeline_mode = #tpu.pipeline_mode<synchronous>, transform_indices = @transform_4, window_bounds = array<i64: 1, 128>}, {pipeline_mode = #tpu.pipeline_mode<synchronous>, transform_indices = @transform_5, window_bounds = array<i64: 128, 128>}, {pipeline_mode = #tpu.pipeline_mode<synchronous>, transform_indices = @transform_6, window_bounds = array<i64: 1, 128>}, {transform_indices = @transform_7, window_bounds = array<i64: 104, 128>}]} {
    %c0 = arith.constant 0 : index
    %c0_0 = arith.constant 0 : index
    %0 = vector.load %arg1[%c0, %c0_0] : memref<104x32xf32, #tpu.memory_space<vmem>>, vector<104x32xf32>
    %c0_1 = arith.constant 0 : index
    %c0_2 = arith.constant 0 : index
    %1 = vector.load %arg2[%c0_1, %c0_2] : memref<32x128xf32, #tpu.memory_space<vmem>>, vector<32x128xf32>
    %cst = arith.constant dense<0.000000e+00> : vector<104x128xf32>
    %2 = tpu.matmul %0, %1, %cst {dimension_numbers = #tpu.dot_dimension_numbers<[1], [0], [0], [1], [0, 0, 1, 1], [], []>} : vector<104x32xf32>, vector<32x128xf32>, vector<104x128xf32> -> vector<104x128xf32>
    %c0_3 = arith.constant 0 : index
    %c0_4 = arith.constant 0 : index
    %3 = vector.load %arg3[%c0_3, %c0_4] : memref<1x128xf32, #tpu.memory_space<vmem>>, vector<1x128xf32>
    %4 = vector.broadcast %3 : vector<1x128xf32> to vector<104x128xf32>
    %5 = arith.addf %2, %4 : vector<104x128xf32>
    %cst_5 = arith.constant 0.000000e+00 : f32
    %6 = vector.broadcast %cst_5 : f32 to vector<104x128xf32>
    %7 = arith.maximumf %5, %6 : vector<104x128xf32>
    %c0_6 = arith.constant 0 : index
    %c0_7 = arith.constant 0 : index
    %8 = vector.load %arg4[%c0_6, %c0_7] : memref<128x128xf32, #tpu.memory_space<vmem>>, vector<128x128xf32>
    %cst_8 = arith.constant dense<0.000000e+00> : vector<104x128xf32>
    %9 = tpu.matmul %7, %8, %cst_8 {dimension_numbers = #tpu.dot_dimension_numbers<[1], [0], [0], [1], [0, 0, 1, 1], [], []>} : vector<104x128xf32>, vector<128x128xf32>, vector<104x128xf32> -> vector<104x128xf32>
    %c0_9 = arith.constant 0 : index
    %c0_10 = arith.constant 0 : index
    %10 = vector.load %arg5[%c0_9, %c0_10] : memref<1x128xf32, #tpu.memory_space<vmem>>, vector<1x128xf32>
    %11 = vector.broadcast %10 : vector<1x128xf32> to vector<104x128xf32>
    %12 = arith.addf %9, %11 : vector<104x128xf32>
    %cst_11 = arith.constant 0.000000e+00 : f32
    %13 = vector.broadcast %cst_11 : f32 to vector<104x128xf32>
    %14 = arith.maximumf %12, %13 : vector<104x128xf32>
    %c0_12 = arith.constant 0 : index
    %c0_13 = arith.constant 0 : index
    %15 = vector.load %arg6[%c0_12, %c0_13] : memref<128x128xf32, #tpu.memory_space<vmem>>, vector<128x128xf32>
    %cst_14 = arith.constant dense<0.000000e+00> : vector<104x128xf32>
    %16 = tpu.matmul %14, %15, %cst_14 {dimension_numbers = #tpu.dot_dimension_numbers<[1], [0], [0], [1], [0, 0, 1, 1], [], []>} : vector<104x128xf32>, vector<128x128xf32>, vector<104x128xf32> -> vector<104x128xf32>
    %c0_15 = arith.constant 0 : index
    %c0_16 = arith.constant 0 : index
    %17 = vector.load %arg7[%c0_15, %c0_16] : memref<1x128xf32, #tpu.memory_space<vmem>>, vector<1x128xf32>
    %18 = vector.broadcast %17 : vector<1x128xf32> to vector<104x128xf32>
    %19 = arith.addf %16, %18 : vector<104x128xf32>
    %cst_17 = arith.constant dense<0xFF800000> : vector<104xf32>
    %20 = vector.multi_reduction <maximumf>, %19, %cst_17 [1] : vector<104x128xf32> to vector<104xf32>
    %21 = vector.shape_cast %20 : vector<104xf32> to vector<104x1xf32>
    %22 = vector.broadcast %21 : vector<104x1xf32> to vector<104x128xf32>
    %23 = arith.subf %19, %22 : vector<104x128xf32>
    %24 = math.exp %23 : vector<104x128xf32>
    %cst_18 = arith.constant dense<0.000000e+00> : vector<104xf32>
    %25 = vector.multi_reduction <add>, %24, %cst_18 [1] : vector<104x128xf32> to vector<104xf32>
    %26 = vector.shape_cast %25 : vector<104xf32> to vector<104x1xf32>
    %27 = tpu.reciprocal %26 : vector<104x1xf32> -> vector<104x1xf32>
    %28 = vector.broadcast %27 : vector<104x1xf32> to vector<104x128xf32>
    %29 = arith.mulf %24, %28 : vector<104x128xf32>
    %c0_19 = arith.constant 0 : index
    %c0_20 = arith.constant 0 : index
    %30 = vector.load %arg8[%c0_19, %c0_20] : memref<104x128xf32, #tpu.memory_space<vmem>>, vector<104x128xf32>
    tpu.vector_store %arg8[%c0_19, %c0_20], %29 {strides = array<i32>} : memref<104x128xf32, #tpu.memory_space<vmem>>, vector<104x128xf32>,
    return
  }
  func.func @transform_0(%arg0: i32) -> (i32, i32) {
    %c0_i32 = arith.constant 0 : i32
    %c0_i32_0 = arith.constant 0 : i32
    return %arg0, %c0_i32 : i32, i32
  }
  func.func @transform_1(%arg0: i32) -> (i32, i32) {
    %c0_i32 = arith.constant 0 : i32
    %c0_i32_0 = arith.constant 0 : i32
    %c0_i32_1 = arith.constant 0 : i32
    return %c0_i32, %c0_i32_0 : i32, i32
  }
  func.func @transform_2(%arg0: i32) -> (i32, i32) {
    %c0_i32 = arith.constant 0 : i32
    %c0_i32_0 = arith.constant 0 : i32
    %c0_i32_1 = arith.constant 0 : i32
    return %c0_i32, %c0_i32_0 : i32, i32
  }
  func.func @transform_3(%arg0: i32) -> (i32, i32) {
    %c0_i32 = arith.constant 0 : i32
    %c0_i32_0 = arith.constant 0 : i32
    %c0_i32_1 = arith.constant 0 : i32
    return %c0_i32, %c0_i32_0 : i32, i32
  }
  func.func @transform_4(%arg0: i32) -> (i32, i32) {
    %c0_i32 = arith.constant 0 : i32
    %c0_i32_0 = arith.constant 0 : i32
    %c0_i32_1 = arith.constant 0 : i32
    return %c0_i32, %c0_i32_0 : i32, i32
  }
  func.func @transform_5(%arg0: i32) -> (i32, i32) {
    %c0_i32 = arith.constant 0 : i32
    %c0_i32_0 = arith.constant 0 : i32
    %c0_i32_1 = arith.constant 0 : i32
    return %c0_i32, %c0_i32_0 : i32, i32
  }
  func.func @transform_6(%arg0: i32) -> (i32, i32) {
    %c0_i32 = arith.constant 0 : i32
    %c0_i32_0 = arith.constant 0 : i32
    %c0_i32_1 = arith.constant 0 : i32
    return %c0_i32, %c0_i32_0 : i32, i32
  }
  func.func @transform_7(%arg0: i32) -> (i32, i32) {
    %c0_i32 = arith.constant 0 : i32
    %c0_i32_0 = arith.constant 0 : i32
    return %arg0, %c0_i32 : i32, i32
  }
}

</mosaic_0001>

<bundles_post_ra>
// kernel: mlp_forward.1
= control target key start
LH: loop header
LB: loop body
LE: loop exit
PB: predicated region body
PF: predicated region fallthrough
CT: control target
= control target key end

     0   :  { %12 = vsyncpa [#allocation3], 0  ;;  %s1583_s24 = smov 0   ;;  %s1585_s25 = smov 0   ;;  %s1959_s0 = inlined_call_operand.vmem [shape: f32[200,32], index: 0, kind: input, shape index: {}]   ;;  %s1960_s1 = inlined_call_operand.hbm [shape: f32[32,128], index: 1, kind: input, shape index: {}]   ;;  %s1961_s2 = inlined_call_operand.vmem [shape: f32[1,128], index: 2, kind: input, shape index: {}]   ;;  %s1962_s3 = inlined_call_operand.vmem [shape: f32[128,128], index: 3, kind: input, shape index: {}]   ;;  %s1963_s4 = inlined_call_operand.vmem [shape: f32[1,128], index: 4, kind: input, shape index: {}]   ;;  %s1964_s5 = inlined_call_operand.vmem [shape: f32[128,128], index: 5, kind: input, shape index: {}]   ;;  %s1965_s6 = inlined_call_operand.vmem [shape: f32[1,128], index: 6, kind: input, shape index: {}]   ;;  %s1966_s7 = inlined_call_operand.vmem [shape: f32[200,128], index: 7, kind: output, shape index: {}]  }
   0x1   :  { %s1587_s26 = smov 0  }
   0x2 LB: > { %s1596_s27 = sadd.s32 4294967295, %s1506_s26   ;;  %s1598_s28 = sadd.s32 1, %s1506_s26   ;;  %s1506_s26 = sphi %s1587_s26, %s1975_s26   ;;  %s1502_s25 = sphi %s1585_s25, %s1974_s25   ;;  %s1498_s24 = sphi %s1583_s24, %s1973_s24  }
   0x3   : > { %s174_s29 = ssub.s32 %s1506_s26, %s1598_s28  ;;  %s177_s30 = sadd.s32 1, %s1502_s25 }
   0x4   : > { %p175_p0 = scmp.eq.s32.totalorder %s174_s29, 0  ;;  %p187_p1 = scmp.ne.s32.totalorder %s1502_s25, %s1498_s24 }
   0x5   : > { %p188_p2 = scmp.eq.s32.totalorder %s1596_s27, 1  ;;  %p1190_p3 = scmp.ge.s32.totalorder %s1506_s26, 1 }
   0x6   : > { %s1606_s8 = scalar_select %p175_p0, %s1502_s25, %s177_s30  }
   0x7   : > { %p1608_p4 = por %p188_p2, %p187_p1  ;;  %p201_p5 = scmp.lt.s32.totalorder %s1506_s26, 3 }
   0x8   : > { %p1263_p6 = scmp.eq.s32.totalorder %s1596_s27, 0  ;;  %s212_s12 = sshll.u32 %s1960_s1, 4  ;;  %s213_s12 = int_to_ptr.hbm [resolvable:$true] %s212_s12 }
   0x9   : > { %p202_p7 = pnand %p1190_p3, %p201_p5  ;;  %s1540_s13 = smov [#allocation2]  }
   0xa   : > { %s214_s14 = sshll.u32 %s1540_s13, 4  ;;  %s1541_s15 = smov 128   ;;  %s215_s14 = int_to_ptr.vmem [resolvable:$true] %s214_s14 }
   0xb   : > { %p1259_p8 = pneg %p202_p7  ;;  %s1542_s16 = smov 8  }
   0xc   : > { %262 = sbr.rel (%p202_p7) target bundleno = 846 (0x34e), region = 48 }
   0xd   : > { %p1260_p9 = pnand %p1263_p6, %p1259_p8 }
   0xf   : > { %1262 = dma.hbm_to_vmem [thread:$0]  (!%p1260_p9), %s213_s12, 512, %s215_s14, [#allocation3], %s1541_s15, %s1541_s15, %s1542_s16  }
  0x11   : > { %1493 = dma.done.wait (%p1263_p6), [#allocation3], 512  }
  0x12   : > { %1495 = vsyncadd (%p1263_p6), [#allocation3], 4294966784  ;;  %s1623_s17 = smul.u32 13, %s1596_s27  ;;  %v333_v0 = vld [vmem:[#allocation2 + $0x18] sm:$0xff]  ;;  %v332_v1 = vld [vmem:[#allocation2 + $0x10] sm:$0xff]  ;;  %vm338_vm0 = vcmask 261120  }
  0x13   : > { %390 = vmatpush.msra.mxu0 %v333_v0  ;;  %v331_v2 = vld [vmem:[#allocation2 + $0x8] sm:$0xff]  ;;  %v330_v3 = vld [vmem:[#allocation2] sm:$0xff]  ;;  %v462_v13 = vld [vmem:[%s1962_s3 + $0x78] sm:$0xff]  ;;  %s295_s13 = sand.u32 1, %s1498_s24   ;;  %s1221_s16 = smul.u32 (%p1608_p4), 104, %s1596_s27 }
  0x14   : > { %p303_p10 = scmp.lt.s32.totalorder %s1623_s17, 24  ;;  %v461_v14 = vld [vmem:[%s1962_s3 + $0x70] sm:$0xff]  ;;  %467 = vmatpush.msra.mxu1 %v462_v13  ;;  %1222 = vmatpush.msra.mxu3 %v462_v13  ;;  %v460_v15 = vld [vmem:[%s1962_s3 + $0x68] sm:$0xff]  ;;  %v459_v16 = vld [vmem:[%s1962_s3 + $0x60] sm:$0xff]  ;;  %s1254_s14 = smul.u32 104, %s295_s13 }
  0x15   : > { %391 = vmatpush.msra.mxu0 %v332_v1  ;;  %v458_v18 = vld [vmem:[%s1962_s3 + $0x58] sm:$0xff]  ;;  %v457_v19 = vld [vmem:[%s1962_s3 + $0x50] sm:$0xff]  ;;  %v456_v20 = vld [vmem:[%s1962_s3 + $0x48] sm:$0xff]  ;;  %s919_s15 = ssub.s32 (%p1608_p4), 25, %s1623_s17  ;;  %s1873_s20 = scalar_lea.vmem (%p1608_p4), %s1966_s7, %s1221_s16  }
  0x16   : > { %s304_s18 = scalar_select %p303_p10, %s1623_s17, 24  ;;  %468 = vmatpush.msra.mxu1 %v461_v14  ;;  %1223 = vmatpush.msra.mxu3 %v461_v14  ;;  %v455_v21 = vld [vmem:[%s1962_s3 + $0x40] sm:$0xff]  ;;  %v454_v23 = vld [vmem:[%s1962_s3 + $0x38] sm:$0xff]  ;;  %v453_v24 = vld [vmem:[%s1962_s3 + $0x30] sm:$0xff] }
  0x17   : > { %392 = vmatpush.msra.mxu0 %v331_v2  ;;  %v452_v25 = vld [vmem:[%s1962_s3 + $0x28] sm:$0xff]  ;;  %v451_v26 = vld [vmem:[%s1962_s3 + $0x20] sm:$0xff]  ;;  %v450_v28 = vld [vmem:[%s1962_s3 + $0x18] sm:$0xff]  ;;  %s1839_s24 = scalar_lea.vmem [#allocation4], %s1254_s14   ;;  %p920_p11 = scmp.lt.s32.totalorder (%p1608_p4), %s919_s15, 13 }
  0x18   : > { %s1195_s19 = sshll.u32 %s304_s18, 3  ;;  %469 = vmatpush.msra.mxu1 %v460_v15  ;;  %1224 = vmatpush.msra.mxu3 %v460_v15  ;;  %v449_v29 = vld [vmem:[%s1962_s3 + $0x10] sm:$0xff]  ;;  %v448_v31 = vld [vmem:[%s1962_s3 + $0x8] sm:$0xff]  ;;  %v447_v32 = vld [vmem:[%s1962_s3] sm:$0xff] }
  0x19   : > { %s1630_s22 = scalar_lea.vmem %s1959_s0, %s1195_s19  ;;  %393 = vmatpush.msra.mxu0 %v330_v3  ;;  %v1709_v33 = vld [vmem:[%s1961_s2] ss:$0 sm:$0xff]  ;;  %v551_v61 = vld [vmem:[%s1964_s5 + $0x78] sm:$0xff]  ;;  %v550_v62 = vld [vmem:[%s1964_s5 + $0x70] sm:$0xff] }
  0x1a   : > { %v317_v4 = vld [vmem:[%s1630_s22] sm:$0xff]  ;;  %v318_v5 = vld [vmem:[%s1630_s22 + $0x8] sm:$0xff]  ;;  %v319_v6 = vld [vmem:[%s1630_s22 + $0x10] sm:$0xff]  ;;  %470 = vmatpush.msra.mxu1 %v459_v16  ;;  %1225 = vmatpush.msra.mxu3 %v459_v16 }
  0x1b   : > { %1196 = vmatmul.msk.f32.vlgmr.msra.gmra.mxu0 %vm338_vm0, %v317_v4  ;;  %v320_v7 = vld [vmem:[%s1630_s22 + $0x18] sm:$0xff]  ;;  %v321_v8 = vld [vmem:[%s1630_s22 + $0x20] sm:$0xff]  ;;  %v322_v9 = vld [vmem:[%s1630_s22 + $0x28] sm:$0xff]  ;;  %556 = vmatpush.msra.mxu2 %v551_v61 }
  0x1c   : > { %v323_v10 = vld [vmem:[%s1630_s22 + $0x30] sm:$0xff]  ;;  %v324_v11 = vld [vmem:[%s1630_s22 + $0x38] sm:$0xff]  ;;  %v325_v12 = vld [vmem:[%s1630_s22 + $0x40] sm:$0xff]  ;;  %471 = vmatpush.msra.mxu1 %v458_v18  ;;  %1226 = vmatpush.msra.mxu3 %v458_v18 }
  0x1d   : > { %v326_v17 = vld [vmem:[%s1630_s22 + $0x48] sm:$0xff]  ;;  %v327_v22 = vld [vmem:[%s1630_s22 + $0x50] sm:$0xff]  ;;  %v328_v27 = vld [vmem:[%s1630_s22 + $0x58] sm:$0xff]  ;;  %557 = vmatpush.msra.mxu2 %v550_v62 }
  0x1e   : > { %472 = vmatpush.msra.mxu1 %v457_v19  ;;  %1227 = vmatpush.msra.mxu3 %v457_v19  ;;  %v329_v30 = vld [vmem:[%s1630_s22 + $0x60] sm:$0xff]  ;;  %v549_v63 = vld [vmem:[%s1964_s5 + $0x68] sm:$0xff]  ;;  %v547_v4 = vld [vmem:[%s1964_s5 + $0x58] sm:$0xff] }
  0x1f   : > { %v548_v2 = vld [vmem:[%s1964_s5 + $0x60] sm:$0xff]  ;;  %558 = vmatpush.msra.mxu2 %v549_v63  ;;  %v541_v13 = vld [vmem:[%s1964_s5 + $0x28] sm:$0xff]  ;;  %v539_v18 = vld [vmem:[%s1964_s5 + $0x18] sm:$0xff] }
  0x20   : > { %473 = vmatpush.msra.mxu1 %v456_v20  ;;  %1228 = vmatpush.msra.mxu3 %v456_v20  ;;  %v540_v16 = vld [vmem:[%s1964_s5 + $0x20] sm:$0xff] }
  0x21   : > { %559 = vmatpush.msra.mxu2 %v548_v2 }
  0x22   : > { %474 = vmatpush.msra.mxu1 %v455_v21  ;;  %1229 = vmatpush.msra.mxu3 %v455_v21  ;;  %v538_v21 = vld [vmem:[%s1964_s5 + $0x10] sm:$0xff] }
  0x23   : > { %1197 = vmatmul.msk.f32.gmra.mxu0 %vm338_vm0, %v318_v5  ;;  %v546_v5 = vld [vmem:[%s1964_s5 + $0x50] sm:$0xff]  ;;  %560 = vmatpush.msra.mxu2 %v547_v4 }
  0x24   : > { %475 = vmatpush.msra.mxu1 %v454_v23  ;;  %1230 = vmatpush.msra.mxu3 %v454_v23  ;;  %v537_v23 = vld [vmem:[%s1964_s5 + $0x8] sm:$0xff] }
  0x25   : > { %561 = vmatpush.msra.mxu2 %v546_v5 }
  0x26   : > { %476 = vmatpush.msra.mxu1 %v453_v24  ;;  %1231 = vmatpush.msra.mxu3 %v453_v24  ;;  %v536_v24 = vld [vmem:[%s1964_s5] sm:$0xff] }
  0x28   : > { %477 = vmatpush.msra.mxu1 %v452_v25  ;;  %1232 = vmatpush.msra.mxu3 %v452_v25  ;;  %v1358_v25 = vld [vmem:[%s1963_s4] ss:$0 sm:$0xff] }
  0x2a   : > { %478 = vmatpush.msra.mxu1 %v451_v26  ;;  %1233 = vmatpush.msra.mxu3 %v451_v26 }
  0x2b   : > { %1198 = vmatmul.msk.f32.gmra.mxu0 %vm338_vm0, %v319_v6  ;;  %v545_v6 = vld [vmem:[%s1964_s5 + $0x48] sm:$0xff] }
  0x2c   : > { %479 = vmatpush.msra.mxu1 %v450_v28  ;;  %1234 = vmatpush.msra.mxu3 %v450_v28 }
  0x2d   : > { %562 = vmatpush.msra.mxu2 %v545_v6 }
  0x2e   : > { %480 = vmatpush.msra.mxu1 %v449_v29  ;;  %1235 = vmatpush.msra.mxu3 %v449_v29 }
  0x30   : > { %481 = vmatpush.msra.mxu1 %v448_v31  ;;  %1236 = vmatpush.msra.mxu3 %v448_v31 }
  0x32   : > { %482 = vmatpush.msra.mxu1 %v447_v32  ;;  %1237 = vmatpush.msra.mxu3 %v447_v32 }
  0x33   : > { %1199 = vmatmul.msk.f32.gmra.mxu0 %vm338_vm0, %v320_v7 }
  0x34   : > { %1238 = vmatpush.msrb.mxu3 %v551_v61 }
  0x36   : > { %1239 = vmatpush.msrb.mxu3 %v550_v62 }
  0x38   : > { %1240 = vmatpush.msrb.mxu3 %v549_v63 }
  0x3a   : > { %1241 = vmatpush.msrb.mxu3 %v548_v2 }
  0x3b   : > { %1200 = vmatmul.msk.f32.gmra.mxu0 %vm338_vm0, %v321_v8 }
  0x3c   : > { %1242 = vmatpush.msrb.mxu3 %v547_v4 }
  0x3e   : > { %1243 = vmatpush.msrb.mxu3 %v546_v5 }
  0x40   : > { %1244 = vmatpush.msrb.mxu3 %v545_v6 }
  0x43   : > { %1201 = vmatmul.msk.f32.gmra.mxu0 %vm338_vm0, %v322_v9  ;;  %v544_v9 = vld [vmem:[%s1964_s5 + $0x40] sm:$0xff] }
  0x44   : > { %563 = vmatpush.msra.mxu2 %v544_v9  ;;  %1245 = vmatpush.msrb.mxu3 %v544_v9 }
  0x4b   : > { %1202 = vmatmul.msk.f32.gmra.mxu0 %vm338_vm0, %v323_v10 }
  0x53   : > { %1203 = vmatmul.msk.f32.gmra.mxu0 %vm338_vm0, %v324_v11  ;;  %v543_v11 = vld [vmem:[%s1964_s5 + $0x38] sm:$0xff] }
  0x54   : > { %564 = vmatpush.msra.mxu2 %v543_v11  ;;  %1246 = vmatpush.msrb.mxu3 %v543_v11 }
  0x5b   : > { %1204 = vmatmul.msk.f32.gmra.mxu0 %vm338_vm0, %v325_v12  ;;  %v542_v12 = vld [vmem:[%s1964_s5 + $0x30] sm:$0xff] }
  0x5c   : > { %565 = vmatpush.msra.mxu2 %v542_v12  ;;  %1247 = vmatpush.msrb.mxu3 %v542_v12 }
  0x5e   : > { %566 = vmatpush.msra.mxu2 %v541_v13  ;;  %1248 = vmatpush.msrb.mxu3 %v541_v13 }
  0x60   : > { %567 = vmatpush.msra.mxu2 %v540_v16  ;;  %1249 = vmatpush.msrb.mxu3 %v540_v16 }
  0x62   : > { %568 = vmatpush.msra.mxu2 %v539_v18  ;;  %1250 = vmatpush.msrb.mxu3 %v539_v18 }
  0x63   : > { %1205 = vmatmul.msk.f32.gmra.mxu0 %vm338_vm0, %v326_v17 }
  0x64   : > { %569 = vmatpush.msra.mxu2 %v538_v21  ;;  %1251 = vmatpush.msrb.mxu3 %v538_v21 }
  0x66   : > { %570 = vmatpush.msra.mxu2 %v537_v23  ;;  %1252 = vmatpush.msrb.mxu3 %v537_v23 }
  0x68   : > { %571 = vmatpush.msra.mxu2 %v536_v24  ;;  %1253 = vmatpush.msrb.mxu3 %v536_v24 }
  0x6b   : > { %1206 = vmatmul.msk.f32.gmra.mxu0 %vm338_vm0, %v327_v22 }
  0x73   : > { %1207 = vmatmul.msk.f32.gmra.mxu0 %vm338_vm0, %v328_v27 }
  0x7b   : > { %1208 = vmatmul.msk.f32.gmra.mxu0 %vm338_vm0, %v329_v30 }
  0x98   : > { %v395_v34 = vpop.f32.mrf.mxu0 }
  0x99   : > { %v396_v35 = vadd.f32 %v1709_v33, %v395_v34 }
  0x9b   : > { %v434_v36 = vmax.f32 %v396_v35, 0.0 }
  0x9d   : > { %483 = vmatmul.f32.vlgmr.msra.gmra.mxu1 %v434_v36 }
  0xa0   : > { %v398_v37 = vpop.f32.mrf.mxu0 }
  0xa1   : > { %v399_v38 = vadd.f32 %v1709_v33, %v398_v37 }
  0xa3   : > { %v435_v39 = vmax.f32 %v399_v38, 0.0 }
  0xa5   : > { %486 = vmatmul.f32.gmra.mxu1 %v435_v39 }
  0xa8   : > { %v401_v40 = vpop.f32.mrf.mxu0 }
  0xa9   : > { %v402_v41 = vadd.f32 %v1709_v33, %v401_v40 }
  0xab   : > { %v436_v42 = vmax.f32 %v402_v41, 0.0 }
  0xad   : > { %489 = vmatmul.f32.gmra.mxu1 %v436_v42 }
  0xb0   : > { %v404_v43 = vpop.f32.mrf.mxu0 }
  0xb1   : > { %v405_v44 = vadd.f32 %v1709_v33, %v404_v43 }
  0xb3   : > { %v437_v45 = vmax.f32 %v405_v44, 0.0 }
  0xb5   : > { %492 = vmatmul.f32.gmra.mxu1 %v437_v45 }
  0xb8   : > { %v407_v46 = vpop.f32.mrf.mxu0 }
  0xb9   : > { %v408_v47 = vadd.f32 %v1709_v33, %v407_v46 }
  0xbb   : > { %v438_v48 = vmax.f32 %v408_v47, 0.0 }
  0xbd   : > { %495 = vmatmul.f32.gmra.mxu1 %v438_v48 }
  0xc0   : > { %v410_v49 = vpop.f32.mrf.mxu0 }
  0xc1   : > { %v411_v50 = vadd.f32 %v1709_v33, %v410_v49 }
  0xc3   : > { %v439_v51 = vmax.f32 %v411_v50, 0.0 }
  0xc5   : > { %498 = vmatmul.f32.gmra.mxu1 %v439_v51 }
  0xc8   : > { %v413_v52 = vpop.f32.mrf.mxu0 }
  0xc9   : > { %v414_v53 = vadd.f32 %v1709_v33, %v413_v52 }
  0xcb   : > { %v440_v54 = vmax.f32 %v414_v53, 0.0 }
  0xcd   : > { %501 = vmatmul.f32.gmra.mxu1 %v440_v54 }
  0xd0   : > { %v416_v55 = vpop.f32.mrf.mxu0 }
  0xd1   : > { %v417_v56 = vadd.f32 %v1709_v33, %v416_v55 }
  0xd3   : > { %v441_v57 = vmax.f32 %v417_v56, 0.0 }
  0xd5   : > { %504 = vmatmul.f32.gmra.mxu1 %v441_v57 }
  0xd8   : > { %v419_v58 = vpop.f32.mrf.mxu0 }
  0xd9   : > { %v420_v59 = vadd.f32 %v1709_v33, %v419_v58 }
  0xdb   : > { %v442_v60 = vmax.f32 %v420_v59, 0.0 }
  0xdd   : > { %507 = vmatmul.f32.gmra.mxu1 %v442_v60 }
  0xe0   : > { %v422_v0 = vpop.f32.mrf.mxu0 }
  0xe1   : > { %v423_v1 = vadd.f32 %v1709_v33, %v422_v0 }
  0xe3   : > { %v443_v3 = vmax.f32 %v423_v1, 0.0  ;;  %v1359_v1 = vld [vmem:[%s1965_s6] ss:$0 sm:$0xff] }
  0xe5   : > { %510 = vmatmul.f32.vlgmr.msra.gmra.mxu3 %v443_v3 }
  0xe8   : > { %v425_v7 = vpop.f32.mrf.mxu0 }
  0xe9   : > { %v426_v8 = vadd.f32 %v1709_v33, %v425_v7 }
  0xeb   : > { %v444_v10 = vmax.f32 %v426_v8, 0.0 }
  0xed   : > { %513 = vmatmul.f32.gmra.mxu3 %v444_v10 }
  0xf0   : > { %v428_v14 = vpop.f32.mrf.mxu0 }
  0xf1   : > { %v429_v15 = vadd.f32 %v1709_v33, %v428_v14 }
  0xf3   : > { %v445_v17 = vmax.f32 %v429_v15, 0.0 }
  0xf5   : > { %516 = vmatmul.f32.gmra.mxu3 %v445_v17 }
  0xf8   : > { %v431_v19 = vpop.f32.mrf.mxu0 }
  0xf9   : > { %v432_v20 = vadd.f32 %v1709_v33, %v431_v19 }
  0xfb   : > { %v446_v22 = vmax.f32 %v432_v20, 0.0 }
  0xfd   : > { %519 = vmatmul.f32.gmra.mxu3 %v446_v22 }
 0x11a   : > { %v484_v26 = vpop.f32.mrf.mxu1 }
 0x11b   : > { %v485_v27 = vadd.f32 %v1358_v25, %v484_v26 }
 0x11d   : > { %v523_v28 = vmax.f32 %v485_v27, 0.0 }
 0x11f   : > { %572 = vmatmul.f32.vlgmr.msra.gmra.mxu2 %v523_v28 }
 0x122   : > { %v487_v29 = vpop.f32.mrf.mxu1 }
 0x123   : > { %v488_v30 = vadd.f32 %v1358_v25, %v487_v29 }
 0x125   : > { %v524_v31 = vmax.f32 %v488_v30, 0.0 }
 0x127   : > { %575 = vmatmul.f32.gmra.mxu2 %v524_v31 }
 0x12a   : > { %v490_v32 = vpop.f32.mrf.mxu1 }
 0x12b   : > { %v491_v33 = vadd.f32 %v1358_v25, %v490_v32 }
 0x12d   : > { %v525_v34 = vmax.f32 %v491_v33, 0.0 }
 0x12f   : > { %578 = vmatmul.f32.gmra.mxu2 %v525_v34 }
 0x132   : > { %v493_v35 = vpop.f32.mrf.mxu1 }
 0x133   : > { %v494_v36 = vadd.f32 %v1358_v25, %v493_v35 }
 0x135   : > { %v526_v37 = vmax.f32 %v494_v36, 0.0 }
 0x137   : > { %581 = vmatmul.f32.gmra.mxu2 %v526_v37 }
 0x13a   : > { %v496_v38 = vpop.f32.mrf.mxu1 }
 0x13b   : > { %v497_v39 = vadd.f32 %v1358_v25, %v496_v38 }
 0x13d   : > { %v527_v40 = vmax.f32 %v497_v39, 0.0 }
 0x13f   : > { %584 = vmatmul.f32.gmra.mxu2 %v527_v40 }
 0x142   : > { %v499_v41 = vpop.f32.mrf.mxu1 }
 0x143   : > { %v500_v42 = vadd.f32 %v1358_v25, %v499_v41 }
 0x145   : > { %v528_v43 = vmax.f32 %v500_v42, 0.0 }
 0x147   : > { %587 = vmatmul.f32.gmra.mxu2 %v528_v43 }
 0x14a   : > { %v502_v44 = vpop.f32.mrf.mxu1 }
 0x14b   : > { %v503_v45 = vadd.f32 %v1358_v25, %v502_v44 }
 0x14d   : > { %v529_v46 = vmax.f32 %v503_v45, 0.0 }
 0x14f   : > { %590 = vmatmul.f32.gmra.mxu2 %v529_v46 }
 0x152   : > { %v505_v47 = vpop.f32.mrf.mxu1 }
 0x153   : > { %v506_v48 = vadd.f32 %v1358_v25, %v505_v47 }
 0x155   : > { %v530_v49 = vmax.f32 %v506_v48, 0.0 }
 0x157   : > { %593 = vmatmul.f32.gmra.mxu2 %v530_v49 }
 0x15a   : > { %v508_v50 = vpop.f32.mrf.mxu1 }
 0x15b   : > { %v509_v51 = vadd.f32 %v1358_v25, %v508_v50 }
 0x15d   : > { %v531_v52 = vmax.f32 %v509_v51, 0.0 }
 0x15f   : > { %596 = vmatmul.f32.gmra.mxu2 %v531_v52 }
 0x168   : > { %v511_v53 = vpop.f32.mrf.mxu3 }
 0x169   : > { %v512_v54 = vadd.f32 %v1358_v25, %v511_v53 }
 0x16b   : > { %v532_v55 = vmax.f32 %v512_v54, 0.0 }
 0x16d   : > { %599 = vmatmul.f32.vlgmr.msrb.gmra.mxu3 %v532_v55 }
 0x170   : > { %v514_v56 = vpop.f32.mrf.mxu3 }
 0x171   : > { %v515_v57 = vadd.f32 %v1358_v25, %v514_v56 }
 0x173   : > { %v533_v58 = vmax.f32 %v515_v57, 0.0 }
 0x175   : > { %602 = vmatmul.f32.gmra.mxu3 %v533_v58 }
 0x178   : > { %v517_v59 = vpop.f32.mrf.mxu3 }
 0x179   : > { %v518_v60 = vadd.f32 %v1358_v25, %v517_v59 }
 0x17b   : > { %v534_v61 = vmax.f32 %v518_v60, 0.0 }
 0x17d   : > { %605 = vmatmul.f32.gmra.mxu3 %v534_v61 }
 0x180   : > { %v520_v62 = vpop.f32.mrf.mxu3 }
 0x181   : > { %v521_v63 = vadd.f32 %v1358_v25, %v520_v62 }
 0x183   : > { %v535_v0 = vmax.f32 %v521_v63, 0.0 }
 0x185   : > { %608 = vmatmul.f32.gmra.mxu3 %v535_v0 }
 0x1a2   : > { %v573_v2 = vpop.f32.mrf.mxu2 }
 0x1a3   : > { %v574_v3 = vadd.f32 %v1359_v1, %v573_v2 }
 0x1a5   : > { %612 = vmax.xlane.f32.xlu0 %v574_v3 }
 0x1aa   : > { %v576_v4 = vpop.f32.mrf.mxu2 }
 0x1ab   : > { %v577_v5 = vadd.f32 %v1359_v1, %v576_v4 }
 0x1ad   : > { %614 = vmax.xlane.f32.xlu0 %v577_v5 }
 0x1b2   : > { %v579_v6 = vpop.f32.mrf.mxu2 }
 0x1b3   : > { %v580_v7 = vadd.f32 %v1359_v1, %v579_v6 }
 0x1b5   : > { %616 = vmax.xlane.f32.xlu1 %v580_v7 }
 0x1ba   : > { %v582_v8 = vpop.f32.mrf.mxu2 }
 0x1bb   : > { %v583_v9 = vadd.f32 %v1359_v1, %v582_v8 }
 0x1bd   : > { %618 = vmax.xlane.f32.xlu1 %v583_v9 }
 0x1c2   : > { %v585_v10 = vpop.f32.mrf.mxu2 }
 0x1c3   : > { %v586_v11 = vadd.f32 %v1359_v1, %v585_v10 }
 0x1c5   : > { %620 = vmax.xlane.f32.xlu2 %v586_v11 }
 0x1ca   : > { %v588_v12 = vpop.f32.mrf.mxu2 }
 0x1cb   : > { %v589_v13 = vadd.f32 %v1359_v1, %v588_v12 }
 0x1cd   : > { %622 = vmax.xlane.f32.xlu2 %v589_v13 }
 0x1d2   : > { %v591_v14 = vpop.f32.mrf.mxu2 }
 0x1d3   : > { %v592_v15 = vadd.f32 %v1359_v1, %v591_v14 }
 0x1d5   : > { %624 = vmax.xlane.f32.xlu0 %v592_v15 }
 0x1da   : > { %v594_v16 = vpop.f32.mrf.mxu2 }
 0x1db   : > { %v595_v17 = vadd.f32 %v1359_v1, %v594_v16 }
 0x1dd   : > { %626 = vmax.xlane.f32.xlu1 %v595_v17 }
 0x1e2   : > { %v597_v18 = vpop.f32.mrf.mxu2 }
 0x1e3   : > { %v1778_v19 = vadd.f32 %v1359_v1, %v597_v18 }
 0x1e5   : > { %628 = vmax.xlane.f32.xlu2 %v1778_v19 }
 0x1f0   : > { %v600_v20 = vpop.f32.mrf.mxu3 }
 0x1f1   : > { %v1781_v21 = vadd.f32 %v1359_v1, %v600_v20 }
 0x1f3   : > { %630 = vmax.xlane.f32.xlu0 %v1781_v21 }
 0x1f8   : > { %v603_v22 = vpop.f32.mrf.mxu3 }
 0x1f9   : > { %v1784_v23 = vadd.f32 %v1359_v1, %v603_v22 }
 0x1fb   : > { %632 = vmax.xlane.f32.xlu1 %v1784_v23 }
 0x200   : > { %v606_v24 = vpop.f32.mrf.mxu3 }
 0x201   : > { %v1787_v25 = vadd.f32 %v1359_v1, %v606_v24 }
 0x203   : > { %634 = vmax.xlane.f32.xlu2 %v1787_v25 }
 0x208   : > { %v609_v26 = vpop.f32.mrf.mxu3 }
 0x209   : > { %v1790_v27 = vadd.f32 %v1359_v1, %v609_v26 }
 0x20b   : > { %636 = vmax.xlane.f32.xlu0 %v1790_v27 }
 0x218   : > { %v613_v28 = vpop.xlane.xlu0 %612 }
 0x219   : > { %v638_v29 = vsub.f32 %v574_v3, %v613_v28 }
 0x21b   : > { %v651_v30 = vmul.f32 1.442695, %v638_v29 }
 0x21d   : > { %1360 = vpow2.f32 %v651_v30 }
 0x220   : > { %v615_v31 = vpop.xlane.xlu0 %614 }
 0x221   : > { %v639_v32 = vsub.f32 %v577_v5, %v615_v31 }
 0x223   : > { %v1793_v33 = vpop.eup %1360  ;;  %v653_v34 = vmul.f32 1.442695, %v639_v32 }
 0x224   : > { %677 = vadd.xlane.f32.xlu1 %v1793_v33 }
 0x225   : > { %1362 = vpow2.f32 %v653_v34 }
 0x228   : > { %v617_v35 = vpop.xlane.xlu1 %616 }
 0x229   : > { %v640_v36 = vsub.f32 %v580_v7, %v617_v35 }
 0x22b   : > { %v1796_v37 = vpop.eup %1362  ;;  %v655_v38 = vmul.f32 1.442695, %v640_v36 }
 0x22c   : > { %679 = vadd.xlane.f32.xlu2 %v1796_v37 }
 0x22d   : > { %1364 = vpow2.f32 %v655_v38 }
 0x230   : > { %v619_v39 = vpop.xlane.xlu1 %618 }
 0x231   : > { %v641_v40 = vsub.f32 %v583_v9, %v619_v39 }
 0x233   : > { %v1799_v41 = vpop.eup %1364  ;;  %v657_v42 = vmul.f32 1.442695, %v641_v40 }
 0x234   : > { %681 = vadd.xlane.f32.xlu0 %v1799_v41 }
 0x235   : > { %1366 = vpow2.f32 %v657_v42 }
 0x238   : > { %v621_v43 = vpop.xlane.xlu2 %620 }
 0x239   : > { %v642_v44 = vsub.f32 %v586_v11, %v621_v43 }
 0x23b   : > { %v1802_v45 = vpop.eup %1366  ;;  %v659_v46 = vmul.f32 1.442695, %v642_v44 }
 0x23c   : > { %683 = vadd.xlane.f32.xlu1 %v1802_v45 }
 0x23d   : > { %1368 = vpow2.f32 %v659_v46 }
 0x240   : > { %v623_v47 = vpop.xlane.xlu2 %622 }
 0x241   : > { %v643_v48 = vsub.f32 %v589_v13, %v623_v47 }
 0x243   : > { %v1805_v49 = vpop.eup %1368  ;;  %v661_v50 = vmul.f32 1.442695, %v643_v48 }
 0x244   : > { %685 = vadd.xlane.f32.xlu2 %v1805_v49 }
 0x245   : > { %1370 = vpow2.f32 %v661_v50 }
 0x248   : > { %v625_v51 = vpop.xlane.xlu0 %624 }
 0x249   : > { %v644_v52 = vsub.f32 %v592_v15, %v625_v51 }
 0x24b   : > { %v1808_v53 = vpop.eup %1370  ;;  %v663_v54 = vmul.f32 1.442695, %v644_v52 }
 0x24c   : > { %687 = vadd.xlane.f32.xlu0 %v1808_v53 }
 0x24d   : > { %1372 = vpow2.f32 %v663_v54 }
 0x250   : > { %v627_v55 = vpop.xlane.xlu1 %626 }
 0x251   : > { %v645_v56 = vsub.f32 %v595_v17, %v627_v55 }
 0x253   : > { %v1811_v57 = vpop.eup %1372  ;;  %v665_v58 = vmul.f32 1.442695, %v645_v56 }
 0x254   : > { %689 = vadd.xlane.f32.xlu1 %v1811_v57 }
 0x255   : > { %1374 = vpow2.f32 %v665_v58 }
 0x258   : > { %v629_v59 = vpop.xlane.xlu2 %628 }
 0x259   : > { %v646_v60 = vsub.f32 %v1778_v19, %v629_v59 }
 0x25b   : > { %v1815_v61 = vpop.eup %1374  ;;  %v667_v62 = vmul.f32 1.442695, %v646_v60 }
 0x25c   : > { %691 = vadd.xlane.f32.xlu2 %v1815_v61 }
 0x25d   : > { %1376 = vpow2.f32 %v667_v62 }
 0x263   : > { %v1818_v63 = vpop.eup %1376 }
 0x264   : > { %693 = vadd.xlane.f32.xlu0 %v1818_v63 }
 0x266   : > { %v631_v0 = vpop.xlane.xlu0 %630 }
 0x267   : > { %v647_v1 = vsub.f32 %v1781_v21, %v631_v0 }
 0x269   : > { %v669_v2 = vmul.f32 1.442695, %v647_v1 }
 0x26b   : > { %1378 = vpow2.f32 %v669_v2 }
 0x26e   : > { %v633_v3 = vpop.xlane.xlu1 %632 }
 0x26f   : > { %v648_v4 = vsub.f32 %v1784_v23, %v633_v3 }
 0x271   : > { %v1823_v5 = vpop.eup %1378  ;;  %v671_v6 = vmul.f32 1.442695, %v648_v4 }
 0x272   : > { %695 = vadd.xlane.f32.xlu1 %v1823_v5 }
 0x273   : > { %1380 = vpow2.f32 %v671_v6 }
 0x276   : > { %v635_v7 = vpop.xlane.xlu2 %634 }
 0x277   : > { %v649_v8 = vsub.f32 %v1787_v25, %v635_v7 }
 0x279   : > { %v1827_v9 = vpop.eup %1380  ;;  %v673_v10 = vmul.f32 1.442695, %v649_v8 }
 0x27a   : > { %697 = vadd.xlane.f32.xlu2 %v1827_v9 }
 0x27b   : > { %1382 = vpow2.f32 %v673_v10 }
 0x27e   : > { %v637_v11 = vpop.xlane.xlu0 %636 }
 0x27f   : > { %v650_v12 = vsub.f32 %v1790_v27, %v637_v11 }
 0x281   : > { %v1831_v13 = vpop.eup %1382  ;;  %v675_v14 = vmul.f32 1.442695, %v650_v12 }
 0x282   : > { %699 = vadd.xlane.f32.xlu0 %v1831_v13 }
 0x283   : > { %1384 = vpow2.f32 %v675_v14 }
 0x289   : > { %v1834_v15 = vpop.eup %1384 }
 0x28a   : > { %701 = vadd.xlane.f32.xlu1 %v1834_v15 }
 0x297   : > { %v678_v16 = vpop.xlane.xlu1 %677 }
 0x298   : > { %1386 = vrcp.f32 %v678_v16  ;;  %v714_v21 = vand.u32 2147483648, %v678_v16  ;;  %v712_v23 = vand.u32 2147483647, %v678_v16  ;;  %vm708_vm2 = vweird.f32 %v678_v16 }
 0x29a   : > { %v715_v26 = vor.u32 1.1754944e-38, %v714_v21  ;;  %vm713_vm4 = vcmp.eq.f32.partialorder %v712_v23, 8.507059e+37 }
 0x29e   : > { %v1387_v17 = vpop.eup %1386 }
 0x29f   : > { %v704_v18 = vmul.f32 %v1387_v17, %v678_v16  ;;  %v680_v19 = vpop.xlane.xlu2 %679  ;;  %vm709_vm1 = vweird.f32 %v1387_v17 }
 0x2a0   : > { %1388 = vrcp.f32 %v680_v19  ;;  %vm710_vm3 = vmor %vm708_vm2, %vm709_vm1  ;;  %v728_v34 = vand.u32 2147483648, %v680_v19  ;;  %v726_v36 = vand.u32 2147483647, %v680_v19  ;;  %vm722_vm6 = vweird.f32 %v680_v19 }
 0x2a1   : > { %v705_v20 = vsub.f32 1.0, %v704_v18 }
 0x2a2   : > { %v729_v40 = vor.u32 1.1754944e-38, %v728_v34  ;;  %vm727_vm8 = vcmp.eq.f32.partialorder %v726_v36, 8.507059e+37 }
 0x2a3   : > { %v706_v22 = vmul.f32 %v1387_v17, %v705_v20 }
 0x2a5   : > { %v707_v24 = vadd.f32 %v1387_v17, %v706_v22 }
 0x2a6   : > { %v1389_v25 = vpop.eup %1388 }
 0x2a7   : > { %v711_v27 = vsel %vm710_vm3, %v1387_v17, %v707_v24  ;;  %v718_v28 = vmul.f32 %v1389_v25, %v680_v19  ;;  %v682_v29 = vpop.xlane.xlu0 %681  ;;  %vm723_vm5 = vweird.f32 %v1389_v25 }
 0x2a8   : > { %v716_v30 = vsel %vm713_vm4, %v715_v26, %v711_v27  ;;  %1390 = vrcp.f32 %v682_v29  ;;  %vm724_vm7 = vmor %vm722_vm6, %vm723_vm5  ;;  %v742_v48 = vand.u32 2147483648, %v682_v29  ;;  %v740_v51 = vand.u32 2147483647, %v682_v29 }
 0x2a9   : > { %v885_v31 = vmul.f32 %v1793_v33, %v716_v30  ;;  %v719_v32 = vsub.f32 1.0, %v718_v28  ;;  %vm736_vm10 = vweird.f32 %v682_v29 }
 0x2aa   : > { %v743_v55 = vor.u32 1.1754944e-38, %v742_v48  ;;  %vm741_vm12 = vcmp.eq.f32.partialorder %v740_v51, 8.507059e+37 }
 0x2ab   : > { %898 = vst [vmem:[%s1839_s24] sm:$0xff] %v885_v31  ;;  %v720_v35 = vmul.f32 %v1389_v25, %v719_v32 }
 0x2ad   : > { %v721_v38 = vadd.f32 %v1389_v25, %v720_v35 }
 0x2ae   : > { %v1391_v39 = vpop.eup %1390 }
 0x2af   : > { %v725_v42 = vsel %vm724_vm7, %v1389_v25, %v721_v38  ;;  %v732_v43 = vmul.f32 %v1391_v39, %v682_v29  ;;  %v684_v44 = vpop.xlane.xlu1 %683  ;;  %vm737_vm9 = vweird.f32 %v1391_v39 }
 0x2b0   : > { %v730_v33 = vsel %vm727_vm8, %v729_v40, %v725_v42  ;;  %1392 = vrcp.f32 %v684_v44  ;;  %vm738_vm11 = vmor %vm736_vm10, %vm737_vm9  ;;  %v756_v0 = vand.u32 2147483648, %v684_v44  ;;  %v754_v2 = vand.u32 2147483647, %v684_v44 }
 0x2b1   : > { %v886_v46 = vmul.f32 %v1796_v37, %v730_v33  ;;  %v733_v47 = vsub.f32 1.0, %v732_v43  ;;  %vm750_vm14 = vweird.f32 %v684_v44 }
 0x2b2   : > { %v757_v6 = vor.u32 1.1754944e-38, %v756_v0  ;;  %vm755_vm0 = vcmp.eq.f32.partialorder %v754_v2, 8.507059e+37 }
 0x2b3   : > { %899 = vst [vmem:[%s1839_s24 + $0x8] sm:$0xff] %v886_v46  ;;  %v734_v50 = vmul.f32 %v1391_v39, %v733_v47 }
 0x2b5   : > { %v735_v52 = vadd.f32 %v1391_v39, %v734_v50 }
 0x2b6   : > { %v1393_v54 = vpop.eup %1392 }
 0x2b7   : > { %v739_v56 = vsel %vm738_vm11, %v1391_v39, %v735_v52  ;;  %v746_v58 = vmul.f32 %v1393_v54, %v684_v44  ;;  %v686_v59 = vpop.xlane.xlu2 %685  ;;  %vm751_vm13 = vweird.f32 %v1393_v54 }
 0x2b8   : > { %v744_v60 = vsel %vm741_vm12, %v743_v55, %v739_v56  ;;  %1394 = vrcp.f32 %v686_v59  ;;  %vm752_vm15 = vmor %vm750_vm14, %vm751_vm13  ;;  %v770_v14 = vand.u32 2147483648, %v686_v59  ;;  %v768_v17 = vand.u32 2147483647, %v686_v59 }
 0x2b9   : > { %v887_v37 = vmul.f32 %v1799_v41, %v744_v60  ;;  %v747_v62 = vsub.f32 1.0, %v746_v58  ;;  %vm764_vm2 = vweird.f32 %v686_v59 }
 0x2ba   : > { %v771_v20 = vor.u32 1.1754944e-38, %v770_v14  ;;  %vm769_vm4 = vcmp.eq.f32.partialorder %v768_v17, 8.507059e+37 }
 0x2bb   : > { %900 = vst [vmem:[%s1839_s24 + $0x10] sm:$0xff] %v887_v37  ;;  %v748_v1 = vmul.f32 %v1393_v54, %v747_v62 }
 0x2bd   : > { %v749_v3 = vadd.f32 %v1393_v54, %v748_v1 }
 0x2be   : > { %v1395_v4 = vpop.eup %1394 }
 0x2bf   : > { %v753_v7 = vsel %vm752_vm15, %v1393_v54, %v749_v3  ;;  %v760_v8 = vmul.f32 %v1395_v4, %v686_v59  ;;  %v688_v10 = vpop.xlane.xlu0 %687  ;;  %vm765_vm1 = vweird.f32 %v1395_v4 }
 0x2c0   : > { %v758_v11 = vsel %vm755_vm0, %v757_v6, %v753_v7  ;;  %1396 = vrcp.f32 %v688_v10  ;;  %vm766_vm3 = vmor %vm764_vm2, %vm765_vm1  ;;  %v784_v26 = vand.u32 2147483648, %v688_v10  ;;  %v782_v28 = vand.u32 2147483647, %v688_v10 }
 0x2c1   : > { %v888_v41 = vmul.f32 %v1802_v45, %v758_v11  ;;  %v761_v12 = vsub.f32 1.0, %v760_v8  ;;  %vm778_vm6 = vweird.f32 %v688_v10 }
 0x2c2   : > { %v785_v31 = vor.u32 1.1754944e-38, %v784_v26  ;;  %vm783_vm8 = vcmp.eq.f32.partialorder %v782_v28, 8.507059e+37 }
 0x2c3   : > { %901 = vst [vmem:[%s1839_s24 + $0x18] sm:$0xff] %v888_v41  ;;  %v762_v16 = vmul.f32 %v1395_v4, %v761_v12 }
 0x2c5   : > { %v763_v18 = vadd.f32 %v1395_v4, %v762_v16 }
 0x2c6   : > { %v1397_v19 = vpop.eup %1396 }
 0x2c7   : > { %v767_v21 = vsel %vm766_vm3, %v1395_v4, %v763_v18  ;;  %v774_v22 = vmul.f32 %v1397_v19, %v688_v10  ;;  %v690_v23 = vpop.xlane.xlu1 %689  ;;  %vm779_vm5 = vweird.f32 %v1397_v19 }
 0x2c8   : > { %v772_v24 = vsel %vm769_vm4, %v771_v20, %v767_v21  ;;  %1398 = vrcp.f32 %v690_v23  ;;  %vm780_vm7 = vmor %vm778_vm6, %vm779_vm5  ;;  %v798_v39 = vand.u32 2147483648, %v690_v23  ;;  %v796_v42 = vand.u32 2147483647, %v690_v23 }
 0x2c9   : > { %v889_v45 = vmul.f32 %v1805_v49, %v772_v24  ;;  %v775_v25 = vsub.f32 1.0, %v774_v22  ;;  %vm792_vm10 = vweird.f32 %v690_v23 }
 0x2ca   : > { %v799_v33 = vor.u32 1.1754944e-38, %v798_v39  ;;  %vm797_vm12 = vcmp.eq.f32.partialorder %v796_v42, 8.507059e+37 }
 0x2cb   : > { %902 = vst [vmem:[%s1839_s24 + $0x20] sm:$0xff] %v889_v45  ;;  %v776_v27 = vmul.f32 %v1397_v19, %v775_v25 }
 0x2cd   : > { %v777_v29 = vadd.f32 %v1397_v19, %v776_v27 }
 0x2ce   : > { %v1399_v30 = vpop.eup %1398 }
 0x2cf   : > { %v781_v32 = vsel %vm780_vm7, %v1397_v19, %v777_v29  ;;  %v788_v34 = vmul.f32 %v1399_v30, %v690_v23  ;;  %v692_v35 = vpop.xlane.xlu2 %691  ;;  %vm793_vm9 = vweird.f32 %v1399_v30 }
 0x2d0   : > { %v786_v36 = vsel %vm783_vm8, %v785_v31, %v781_v32  ;;  %1400 = vrcp.f32 %v692_v35  ;;  %vm794_vm11 = vmor %vm792_vm10, %vm793_vm9  ;;  %v812_v52 = vand.u32 2147483648, %v692_v35  ;;  %v810_v55 = vand.u32 2147483647, %v692_v35 }
 0x2d1   : > { %v890_v49 = vmul.f32 %v1808_v53, %v786_v36  ;;  %v789_v38 = vsub.f32 1.0, %v788_v34  ;;  %vm806_vm14 = vweird.f32 %v692_v35 }
 0x2d2   : > { %v813_v59 = vor.u32 1.1754944e-38, %v812_v52  ;;  %vm811_vm0 = vcmp.eq.f32.partialorder %v810_v55, 8.507059e+37 }
 0x2d3   : > { %903 = vst [vmem:[%s1839_s24 + $0x28] sm:$0xff] %v890_v49  ;;  %v790_v40 = vmul.f32 %v1399_v30, %v789_v38 }
 0x2d5   : > { %v791_v43 = vadd.f32 %v1399_v30, %v790_v40 }
 0x2d6   : > { %v1401_v44 = vpop.eup %1400 }
 0x2d7   : > { %v795_v46 = vsel %vm794_vm11, %v1399_v30, %v791_v43  ;;  %v802_v47 = vmul.f32 %v1401_v44, %v692_v35  ;;  %v694_v48 = vpop.xlane.xlu0 %693  ;;  %vm807_vm13 = vweird.f32 %v1401_v44 }
 0x2d8   : > { %v800_v50 = vsel %vm797_vm12, %v799_v33, %v795_v46  ;;  %1402 = vrcp.f32 %v694_v48  ;;  %vm808_vm15 = vmor %vm806_vm14, %vm807_vm13  ;;  %v824_v3 = vand.u32 2147483647, %v694_v48  ;;  %vm820_vm2 = vweird.f32 %v694_v48 }
 0x2d9   : > { %v891_v53 = vmul.f32 %v1811_v57, %v800_v50  ;;  %v803_v51 = vsub.f32 1.0, %v802_v47  ;;  %v826_v57 = vand.u32 2147483648, %v694_v48 }
 0x2da   : > { %vm825_vm4 = vcmp.eq.f32.partialorder %v824_v3, 8.507059e+37 }
 0x2db   : > { %904 = vst [vmem:[%s1839_s24 + $0x30] sm:$0xff] %v891_v53  ;;  %v804_v54 = vmul.f32 %v1401_v44, %v803_v51  ;;  %v827_v7 = vor.u32 1.1754944e-38, %v826_v57 }
 0x2dd   : > { %v805_v56 = vadd.f32 %v1401_v44, %v804_v54 }
 0x2de   : > { %v1403_v58 = vpop.eup %1402 }
 0x2df   : > { %v809_v60 = vsel %vm808_vm15, %v1401_v44, %v805_v56  ;;  %v816_v37 = vmul.f32 %v1403_v58, %v694_v48  ;;  %vm821_vm1 = vweird.f32 %v1403_v58 }
 0x2e0   : > { %v814_v62 = vsel %vm811_vm0, %v813_v59, %v809_v60  ;;  %vm822_vm3 = vmor %vm820_vm2, %vm821_vm1 }
 0x2e1   : > { %v892_v0 = vmul.f32 %v1815_v61, %v814_v62  ;;  %v817_v1 = vsub.f32 1.0, %v816_v37 }
 0x2e3   : > { %905 = vst [vmem:[%s1839_s24 + $0x38] sm:$0xff] %v892_v0  ;;  %v818_v2 = vmul.f32 %v1403_v58, %v817_v1 }
 0x2e5   : > { %v819_v4 = vadd.f32 %v1403_v58, %v818_v2  ;;  %v696_v6 = vpop.xlane.xlu1 %695 }
 0x2e6   : > { %1404 = vrcp.f32 %v696_v6  ;;  %v840_v16 = vand.u32 2147483648, %v696_v6  ;;  %v838_v18 = vand.u32 2147483647, %v696_v6  ;;  %vm834_vm6 = vweird.f32 %v696_v6 }
 0x2e7   : > { %v823_v8 = vsel %vm822_vm3, %v1403_v58, %v819_v4 }
 0x2e8   : > { %v828_v10 = vsel %vm825_vm4, %v827_v7, %v823_v8  ;;  %v841_v21 = vor.u32 1.1754944e-38, %v840_v16  ;;  %vm839_vm8 = vcmp.eq.f32.partialorder %v838_v18, 8.507059e+37 }
 0x2e9   : > { %v893_v11 = vmul.f32 %v1818_v63, %v828_v10 }
 0x2eb   : > { %906 = vst [vmem:[%s1839_s24 + $0x40] sm:$0xff] %v893_v11 }
 0x2ec   : > { %v1405_v61 = vpop.eup %1404 }
 0x2ed   : > { %v830_v41 = vmul.f32 %v1405_v61, %v696_v6  ;;  %v698_v12 = vpop.xlane.xlu2 %697  ;;  %vm835_vm5 = vweird.f32 %v1405_v61 }
 0x2ee   : > { %1406 = vrcp.f32 %v698_v12  ;;  %vm836_vm7 = vmor %vm834_vm6, %vm835_vm5  ;;  %v854_v26 = vand.u32 2147483648, %v698_v12  ;;  %v852_v28 = vand.u32 2147483647, %v698_v12  ;;  %vm848_vm10 = vweird.f32 %v698_v12 }
 0x2ef   : > { %v831_v14 = vsub.f32 1.0, %v830_v41 }
 0x2f0   : > { %v855_v31 = vor.u32 1.1754944e-38, %v854_v26  ;;  %vm853_vm12 = vcmp.eq.f32.partialorder %v852_v28, 8.507059e+37 }
 0x2f1   : > { %v832_v17 = vmul.f32 %v1405_v61, %v831_v14 }
 0x2f3   : > { %v833_v19 = vadd.f32 %v1405_v61, %v832_v17 }
 0x2f4   : > { %v1407_v20 = vpop.eup %1406 }
 0x2f5   : > { %v837_v22 = vsel %vm836_vm7, %v1405_v61, %v833_v19  ;;  %v844_v23 = vmul.f32 %v1407_v20, %v698_v12  ;;  %v700_v63 = vpop.xlane.xlu0 %699  ;;  %vm849_vm9 = vweird.f32 %v1407_v20 }
 0x2f6   : > { %v842_v24 = vsel %vm839_vm8, %v841_v21, %v837_v22  ;;  %1408 = vrcp.f32 %v700_v63  ;;  %vm850_vm11 = vmor %vm848_vm10, %vm849_vm9  ;;  %v868_v38 = vand.u32 2147483648, %v700_v63  ;;  %v866_v40 = vand.u32 2147483647, %v700_v63 }
 0x2f7   : > { %v894_v45 = vmul.f32 %v1823_v5, %v842_v24  ;;  %v845_v25 = vsub.f32 1.0, %v844_v23  ;;  %vm862_vm14 = vweird.f32 %v700_v63 }
 0x2f8   : > { %v869_v44 = vor.u32 1.1754944e-38, %v868_v38  ;;  %vm867_vm0 = vcmp.eq.f32.partialorder %v866_v40, 8.507059e+37 }
 0x2f9   : > { %907 = vst [vmem:[%s1839_s24 + $0x48] sm:$0xff] %v894_v45  ;;  %v846_v27 = vmul.f32 %v1407_v20, %v845_v25 }
 0x2fb   : > { %v847_v29 = vadd.f32 %v1407_v20, %v846_v27 }
 0x2fc   : > { %v1409_v30 = vpop.eup %1408 }
 0x2fd   : > { %v851_v32 = vsel %vm850_vm11, %v1407_v20, %v847_v29  ;;  %v858_v34 = vmul.f32 %v1409_v30, %v700_v63  ;;  %v702_v35 = vpop.xlane.xlu1 %701  ;;  %vm863_vm13 = vweird.f32 %v1409_v30 }
 0x2fe   : > { %v856_v36 = vsel %vm853_vm12, %v855_v31, %v851_v32  ;;  %1410 = vrcp.f32 %v702_v35  ;;  %vm864_vm15 = vmor %vm862_vm14, %vm863_vm13  ;;  %v882_v50 = vand.u32 2147483648, %v702_v35  ;;  %v880_v51 = vand.u32 2147483647, %v702_v35 }
 0x2ff   : > { %v895_v5 = vmul.f32 %v1827_v9, %v856_v36  ;;  %v859_v49 = vsub.f32 1.0, %v858_v34  ;;  %vm876_vm2 = vweird.f32 %v702_v35 }
 0x300   : > { %v883_v54 = vor.u32 1.1754944e-38, %v882_v50  ;;  %vm881_vm4 = vcmp.eq.f32.partialorder %v880_v51, 8.507059e+37 }
 0x301   : > { %908 = vst [vmem:[%s1839_s24 + $0x50] sm:$0xff] %v895_v5  ;;  %v860_v39 = vmul.f32 %v1409_v30, %v859_v49 }
 0x303   : > { %v861_v42 = vadd.f32 %v1409_v30, %v860_v39 }
 0x304   : > { %v1411_v43 = vpop.eup %1410 }
 0x305   : > { %v865_v33 = vsel %vm864_vm15, %v1409_v30, %v861_v42  ;;  %v872_v46 = vmul.f32 %v1411_v43, %v702_v35  ;;  %vm877_vm1 = vweird.f32 %v1411_v43 }
 0x306   : > { %v870_v47 = vsel %vm867_vm0, %v869_v44, %v865_v33  ;;  %vm878_vm3 = vmor %vm876_vm2, %vm877_vm1 }
 0x307   : > { %v896_v48 = vmul.f32 %v1831_v13, %v870_v47  ;;  %v873_v9 = vsub.f32 1.0, %v872_v46 }
 0x309   : > { %909 = vst [vmem:[%s1839_s24 + $0x58] sm:$0xff] %v896_v48  ;;  %v874_v53 = vmul.f32 %v1411_v43, %v873_v9 }
 0x30b   : > { %v875_v52 = vadd.f32 %v1411_v43, %v874_v53 }
 0x30d   : > { %v879_v55 = vsel %vm878_vm3, %v1411_v43, %v875_v52  ;;  %917 = sbr.rel (!%p1608_p4) target bundleno = 846 (0x34e), region = 56 }
 0x30e   : > { %v884_v56 = vsel %vm881_vm4, %v883_v54, %v879_v55 }
 0x30f   : > { %v897_v58 = vmul.f32 %v1834_v15, %v884_v56 }
 0x311   : > { %910 = vst [vmem:[%s1839_s24 + $0x60] sm:$0xff] %v897_v58 }
 0x312   : > { %s1977_s15 = smov (!%p920_p11, %s919_s15), 13 }
 0x313   : > { %s1209_s21 = sshll.u32 %s1977_s15, 3 }
 0x314   : > { %p1212_p12 = scmp.eq.s32.totalorder %s1209_s21, 0 }
 0x315   : > { %1412 = sdivrem.u32 (!%p1212_p12), %s1977_s15, 13 }
 0x316   : > { %928 = sbr.rel (%p1212_p12) target bundleno = 846 (0x34e), region = 60 }
 0x31e   : > { %s1879_s9 = spop.drf %1412 }
 0x31f   : > { %s1414_s23 = spop.drf %1412  ;;  %p1213_p13 = scmp.le.s32.totalorder %s1879_s9, 0 }
 0x320   : > { %s1968_s27 = smov (!%p1213_p13), %s1873_s20  ;;  %s1969_s17 = smov (!%p1213_p13), %s1839_s24 }
 0x321   : > { %1136 = sbr.rel (%p1213_p13) target bundleno = 820 (0x334), region = 137  ;;  %s1888_s26 = smov (!%p1213_p13), 0  }
 0x322   : > { %s1890_s29 = smov (!%p1213_p13), 0  }
 0x326 LB: >> { %v1017_v13 = vld [vmem:[%s1514_s17] sm:$0xff]  ;;  %v1019_v15 = vld [vmem:[%s1514_s17 + $0x8] sm:$0xff]  ;;  %v1021_v59 = vld [vmem:[%s1514_s17 + $0x10] sm:$0xff]  ;;  %s1043_s30 = sadd.s32 1, %s1518_s26  ;;  %s1011_s29 = sadd.s32 1, %s1522_s29   ;;  %s1522_s29 = sphi %s1890_s29, %s1011_s29   ;;  %s1518_s26 = sphi %s1888_s26, %s1972_s26   ;;  %s1514_s17 = sphi %s1969_s17, %s1971_s17   ;;  %s1510_s27 = sphi %s1968_s27, %s1970_s27  }
 0x327   : >> { %1018 = vst [vmem:[%s1510_s27] sm:$0xff] %v1017_v13  ;;  %v1023_v60 = vld [vmem:[%s1514_s17 + $0x18] sm:$0xff]  ;;  %p1044_p0 = scmp.ge.s32.totalorder %s1043_s30, %s1879_s9  ;;  %v1025_v37 = vld [vmem:[%s1514_s17 + $0x20] sm:$0xff]  ;;  %v1027_v62 = vld [vmem:[%s1514_s17 + $0x28] sm:$0xff]  ;;  %p1010_p1 = scmp.ge.s32.totalorder %s1011_s29, %s1879_s9 }
 0x328   : >> { %1020 = vst [vmem:[%s1510_s27 + $0x8] sm:$0xff] %v1019_v15  ;;  %v1029_v0 = vld [vmem:[%s1514_s17 + $0x30] sm:$0xff]  ;;  %v1031_v1 = vld [vmem:[%s1514_s17 + $0x38] sm:$0xff]  ;;  %v1033_v57 = vld [vmem:[%s1514_s17 + $0x40] sm:$0xff] }
 0x329   : >> { %1022 = vst [vmem:[%s1510_s27 + $0x10] sm:$0xff] %v1021_v59  ;;  %s1979_s30 = smov (%p1044_p0, %s1043_s30), 0  ;;  %v1035_v2 = vld [vmem:[%s1514_s17 + $0x48] sm:$0xff]  ;;  %v1037_v3 = vld [vmem:[%s1514_s17 + $0x50] sm:$0xff]  ;;  %v1039_v4 = vld [vmem:[%s1514_s17 + $0x58] sm:$0xff] }
 0x32a   : >> { %1024 = vst [vmem:[%s1510_s27 + $0x18] sm:$0xff] %v1023_v60  ;;  %s1046_s22 = smul.u32 104, %s1979_s30  ;;  %v1041_v6 = vld [vmem:[%s1514_s17 + $0x60] sm:$0xff]  ;;  %s1972_s26 = smov %s1979_s30 }
 0x32b   : >> { %1026 = vst [vmem:[%s1510_s27 + $0x20] sm:$0xff] %v1025_v37 }
 0x32c   : >> { %1028 = vst [vmem:[%s1510_s27 + $0x28] sm:$0xff] %v1027_v62  ;;  %s1048_s10 = scalar_lea.vmem %s1839_s24, %s1046_s22 [#allocation4]   ;;  %s1049_s11 = scalar_lea.vmem %s1873_s20, %s1046_s22  }
 0x32d   : >> { %1030 = vst [vmem:[%s1510_s27 + $0x30] sm:$0xff] %v1029_v0  ;;  %s1971_s17 = smov %s1048_s10 }
 0x32e   : >> { %1032 = vst [vmem:[%s1510_s27 + $0x38] sm:$0xff] %v1031_v1 }
 0x32f   : >> { %1034 = vst [vmem:[%s1510_s27 + $0x40] sm:$0xff] %v1033_v57  ;;  %1013 = sbr.rel (!%p1010_p1) target bundleno = 806 (0x326), region = 143 }
 0x330   : >> { %1036 = vst [vmem:[%s1510_s27 + $0x48] sm:$0xff] %v1035_v2 }
 0x331   : >> { %1038 = vst [vmem:[%s1510_s27 + $0x50] sm:$0xff] %v1037_v3 }
 0x332   : >> { %1040 = vst [vmem:[%s1510_s27 + $0x58] sm:$0xff] %v1039_v4 }
 0x333   : >> { %1042 = vst [vmem:[%s1510_s27 + $0x60] sm:$0xff] %v1041_v6  ;;  %s1970_s27 = smov %s1049_s11 }
 0x334 PF: > { %1415 = sdivrem.u32 %s1977_s15, 13 }
 0x335   : > { %s1214_s12 = smul.u32 104, %s1879_s9 }
 0x337   : > { %s1944_s13 = scalar_lea.vmem %s1839_s24, %s1214_s12 [#allocation4]   ;;  %s1056_s14 = scalar_lea.vmem %s1873_s20, %s1214_s12  }
 0x33d   : > { %s1416_s16 = spop.drf %1415 }
 0x33e   : > { %s1417_s18 = spop.drf %1415 }
 0x33f   : > { %p1216_p2 = scmp.le.s32.totalorder %s1417_s18, 0 }
 0x340   : > { %s1524_s19 = smov (!%p1216_p2), %s1056_s14   ;;  %s1528_s21 = smov (!%p1216_p2), %s1944_s13  }
 0x341   : > { %1150 = sbr.rel (%p1216_p2) target bundleno = 846 (0x34e), region = 148  ;;  %s1532_s23 = smov (!%p1216_p2), 0  }
 0x342   : > { %s1536_s29 = smov (!%p1216_p2), 0  }
 0x346 LB: >> { %v1066_v7 = vld [vmem:[%s1530_s21] sm:$0xff]  ;;  %s1068_s24 = sadd.s32 1, %s1534_s23  ;;  %s1060_s29 = sadd.s32 1, %s1538_s29   ;;  %s1538_s29 = sphi %s1536_s29, %s1060_s29   ;;  %s1534_s23 = sphi %s1532_s23, %s1533_s23   ;;  %s1530_s21 = sphi %s1528_s21, %s1073_s21   ;;  %s1526_s19 = sphi %s1524_s19, %s1074_s19  }
 0x347   : >> { %1067 = vst [vmem:[%s1526_s19] sm:$0xff] %v1066_v7  ;;  %p1069_p3 = scmp.ge.s32.totalorder %s1068_s24, %s1417_s18  ;;  %p1059_p4 = scmp.ge.s32.totalorder %s1060_s29, %s1417_s18 }
 0x349   : >> { %s1981_s24 = smov (%p1069_p3, %s1068_s24), 0  ;;  %1062 = sbr.rel (!%p1059_p4) target bundleno = 838 (0x346), region = 154 }
 0x34a   : >> { %s1217_s15 = sshll.u32 %s1981_s24, 3  ;;  %s1533_s23 = smov %s1981_s24  }
 0x34b   : >> { %s1073_s21 = scalar_lea.vmem %s1944_s13, %s1217_s15 [#allocation4]   ;;  %s1074_s19 = scalar_lea.vmem %s1056_s14, %s1217_s15  }
 0x34e PF: > { %p15_p5 = scmp.ge.s32.totalorder %s1598_s28, 4   ;;  %s1973_s24 = smov %s1502_s25 }
 0x34f   : > { %s1974_s25 = smov %s1606_s8  ;;  %s1975_s26 = smov %s1598_s28 }
 0x350   :  { %17 = sbr.rel (!%p15_p5) target bundleno = 2 (0x2), region = 165 }
 0x355   :  { %1090 = vsyncpa [#allocation3], 1 }
 0x356   :  { %1092 = vsyncpa [#allocation3 + $0x1], 1 }

</bundles_post_ra>
